<compile_context>
chip_gen: v6e
topology: v6e:2x2x1
jax: 0.10.0
libtpu: 0.0.40
codegen_flags: <defaults>
</compile_context>

<pallas_src>
import functools

import jax
import jax.numpy as jnp
from jax.experimental import pallas as pl
from jax.experimental.pallas import tpu as pltpu

_LANE = 128      # lane width (last dim)
_SUBLANE = 8     # sublane width (second-to-last dim)


def _round_up(x: int, m: int) -> int:
    return (x + m - 1) // m * m


def _pad2(a, rows: int, cols: int):
    r, c = a.shape
    return jnp.pad(a, ((0, rows - r), (0, cols - c)))


# --------------------------------------------------------------------------- #
# Kernel
# --------------------------------------------------------------------------- #
def _mlp_kernel(x_ref,
                w1_ref, b1_ref,
                w2_ref, b2_ref,
                w3_ref, b3_ref,
                w4_ref, b4_ref,
                o_ref):
    """One batch tile per grid step; all four layers fused, weights resident in VMEM.

    MXU operands are cast to the weight dtype (f32 or bf16); accumulation is
    always f32 (preferred_element_type) and bias-add / tanh run in f32.
    """
    cdt = w1_ref.dtype
    h = jnp.tanh(jnp.dot(x_ref[...].astype(cdt), w1_ref[...],
                         preferred_element_type=jnp.float32) + b1_ref[...])
    h = jnp.tanh(jnp.dot(h.astype(cdt), w2_ref[...],
                         preferred_element_type=jnp.float32) + b2_ref[...])
    h = jnp.tanh(jnp.dot(h.astype(cdt), w3_ref[...],
                         preferred_element_type=jnp.float32) + b3_ref[...])
    out = jnp.dot(h.astype(cdt), w4_ref[...],
                  preferred_element_type=jnp.float32) + b4_ref[...]
    o_ref[...] = out.astype(o_ref.dtype)


# --------------------------------------------------------------------------- #
# Host-side param prep (run once, outside the hot path)
# --------------------------------------------------------------------------- #
def prepare_params(params, compute_dtype=jnp.float32):
    """Pad weights/biases to lane-dense fan_out dims and cast weights.

    * w1 fan_in stays at the true in_dim (obs is not lane-padded).
    * Every fan_out (and w2/w3/w4 fan_in) is rounded up to 128 lanes.
    * Weights are cast to `compute_dtype` (bf16 -> ~3x MXU throughput, half the
      DMA/VMEM); biases stay f32 since bias-add/tanh run in f32.
    Zero padding is exact: zero weight rows/cols contribute nothing, tanh(0)=0.
    Returns (padded_params, out_dim).
    """
    in_dim, hidden = params["w1"].shape
    out_dim = params["w4"].shape[1]
    hid_p = _round_up(hidden, _LANE)
    out_p = _round_up(out_dim, _LANE)

    prepped = {
        "w1": _pad2(params["w1"], in_dim, hid_p).astype(compute_dtype),
        "b1": _pad2(params["b1"], 1, hid_p).astype(jnp.float32),
        "w2": _pad2(params["w2"], hid_p, hid_p).astype(compute_dtype),
        "b2": _pad2(params["b2"], 1, hid_p).astype(jnp.float32),
        "w3": _pad2(params["w3"], hid_p, hid_p).astype(compute_dtype),
        "b3": _pad2(params["b3"], 1, hid_p).astype(jnp.float32),
        "w4": _pad2(params["w4"], hid_p, out_p).astype(compute_dtype),
        "b4": _pad2(params["b4"], 1, out_p).astype(jnp.float32),
    }
    return prepped, out_dim


def _select_tiling(batch: int, max_tile_b: int):
    """Batch tile / grid selection.

    tile_b is a multiple of 8 tracking cdiv(batch, n_tiles) (no tile_b-sized
    over-padding), and n_tiles >= 2 whenever there are >= 16 rows so the
    "parallel" axis actually splits across v7x's two TensorCores.
    """
    pb8 = _round_up(batch, _SUBLANE)
    min_tiles = 2 if pb8 >= 2 * _SUBLANE else 1
    n_tiles = max(pl.cdiv(pb8, max_tile_b), min_tiles)
    tile_b = _round_up(pl.cdiv(pb8, n_tiles), _SUBLANE)
    grid_b = pl.cdiv(batch, tile_b)   # partial last block is masked by Pallas
    return tile_b, grid_b


# --------------------------------------------------------------------------- #
# Forward pass
# --------------------------------------------------------------------------- #
@functools.partial(jax.jit, static_argnames=("out_dim", "max_tile_b"))
def feedforward_nn(obs, padded_params, out_dim, *, max_tile_b=512):
    """Fused MLP forward pass.

    obs:            (batch, in_dim) float-like
    padded_params:  output of prepare_params()
    out_dim:        true output width (static)
    """
    obs = obs.astype(jnp.float32)
    batch, in_dim = obs.shape
    p = padded_params
    out_p = p["w4"].shape[1]

    tile_b, grid_b = _select_tiling(batch, max_tile_b)

    # Weights/biases: full blocks whose block index never changes -> DMA'd once,
    # resident in VMEM across the whole batch grid.
    resident = lambda arr: pl.BlockSpec(arr.shape, lambda i: (0, 0))

    out_padded = pl.pallas_call(
        _mlp_kernel,
        out_shape=jax.ShapeDtypeStruct((batch, out_p), jnp.float32),
        grid=(grid_b,),
        in_specs=[
            # x block: true in_dim as the (full) last dim -> no lane padding.
            pl.BlockSpec((tile_b, in_dim), lambda i: (i, 0)),
            resident(p["w1"]), resident(p["b1"]),
            resident(p["w2"]), resident(p["b2"]),
            resident(p["w3"]), resident(p["b3"]),
            resident(p["w4"]), resident(p["b4"]),
        ],
        out_specs=pl.BlockSpec((tile_b, out_p), lambda i: (i, 0)),
        compiler_params=pltpu.CompilerParams(
            dimension_semantics=("parallel",),
            vmem_limit_bytes=32 * 1024 * 1024),
    )(obs, p["w1"], p["b1"], p["w2"], p["b2"], p["w3"], p["b3"], p["w4"], p["b4"])

    return out_padded[:, :out_dim]


# --------------------------------------------------------------------------- #
# Init + reference
# --------------------------------------------------------------------------- #
def init_params(key, in_dim, hidden_dim, out_dim):
    """Deterministic init mimicking nn.Linear (uniform(-1/sqrt(fan_in), 1/sqrt(fan_in)))."""
    dims = [(in_dim, hidden_dim),
            (hidden_dim, hidden_dim),
            (hidden_dim, hidden_dim),
            (hidden_dim, out_dim)]
    params = {}
    for i, (fan_in, fan_out) in enumerate(dims, start=1):
        key, kw, kb = jax.random.split(key, 3)
        bound = 1.0 / jnp.sqrt(jnp.float32(fan_in))
        # stored as (fan_in, fan_out) == torch weight (fan_out, fan_in) transposed
        params[f"w{i}"] = jax.random.uniform(
            kw, (fan_in, fan_out), jnp.float32, minval=-bound, maxval=bound)
        params[f"b{i}"] = jax.random.uniform(
            kb, (1, fan_out), jnp.float32, minval=-bound, maxval=bound)
    return params


def reference_forward(obs, params):
    h = jnp.tanh(obs @ params["w1"] + params["b1"])
    h = jnp.tanh(h @ params["w2"] + params["b2"])
    h = jnp.tanh(h @ params["w3"] + params["b3"])
    return h @ params["w4"] + params["b4"]


# TODO(synk): log_model (TensorBoard histogram logging) is host-side bookkeeping
# with no kernel equivalent; intentionally not implemented.

if __name__ == "__main__":
    key = jax.random.PRNGKey(0)
    k_obs, k_obs2, k_params = jax.random.split(key, 3)

    in_dim, hidden_dim, out_dim = 16, 32, 8
    params = init_params(k_params, in_dim, hidden_dim, out_dim)

    # ---- f32 path (bit-level tolerance vs. reference) -----------------------
    prep_f32, odim = prepare_params(params, jnp.float32)

    # Small shape (single tile).
    obs = jax.random.normal(k_obs, (8, in_dim), jnp.float32)
    out = jax.block_until_ready(feedforward_nn(obs, prep_f32, odim))
    ref = reference_forward(obs, params)
    assert out.shape == (8, out_dim)
    assert jnp.allclose(out, ref, atol=1e-5, rtol=1e-5), "mismatch vs. reference (batch=8)"

    # Larger, non-aligned batch: exercises multi-tile grid + masked partial block.
    obs2 = jax.random.normal(k_obs2, (300, in_dim), jnp.float32)
    out2 = jax.block_until_ready(feedforward_nn(obs2, prep_f32, odim))
    ref2 = reference_forward(obs2, params)
    assert out2.shape == (300, out_dim)
    assert jnp.allclose(out2, ref2, atol=1e-5, rtol=1e-5), "mismatch vs. reference (batch=300)"

    # ---- bf16 MXU-operand path (f32 accumulation), loose sanity tolerance ----
    prep_bf16, _ = prepare_params(params, jnp.bfloat16)
    out_bf16 = jax.block_until_ready(feedforward_nn(obs2, prep_bf16, odim))
    params_bf16 = {k: (v.astype(jnp.bfloat16).astype(jnp.float32) if k.startswith("w") else v)
                   for k, v in params.items()}
    ref_bf16 = reference_forward(obs2.astype(jnp.bfloat16).astype(jnp.float32), params_bf16)
    assert out_bf16.shape == (300, out_dim)
    assert jnp.allclose(out_bf16, ref_bf16, atol=5e-2, rtol=5e-2), "mismatch vs. bf16 reference"

    print("KERNEL_OK")
</pallas_src>

<mosaic_0001>
module attributes {stable_mosaic.version = 11 : i64} {
  func.func @_mlp_kernel(%arg0: i32, %arg1: memref<8x16xf32, #tpu.memory_space<vmem>>, %arg2: memref<16x128xf32, #tpu.memory_space<vmem>>, %arg3: memref<1x128xf32, #tpu.memory_space<vmem>>, %arg4: memref<128x128xf32, #tpu.memory_space<vmem>>, %arg5: memref<1x128xf32, #tpu.memory_space<vmem>>, %arg6: memref<128x128xf32, #tpu.memory_space<vmem>>, %arg7: memref<1x128xf32, #tpu.memory_space<vmem>>, %arg8: memref<128x128xf32, #tpu.memory_space<vmem>>, %arg9: memref<1x128xf32, #tpu.memory_space<vmem>>, %arg10: memref<8x128xf32, #tpu.memory_space<vmem>>) attributes {dimension_semantics = [#tpu.dimension_semantics<parallel>], iteration_bounds = array<i64: 1>, scalar_prefetch = 0 : i64, scratch_operands = 0 : i64, tpu.core_type = #tpu.core_type<tc>, window_params = [{transform_indices = @transform_0, window_bounds = array<i64: 8, 16>}, {pipeline_mode = #tpu.pipeline_mode<synchronous>, transform_indices = @transform_1, window_bounds = array<i64: 16, 128>}, {pipeline_mode = #tpu.pipeline_mode<synchronous>, transform_indices = @transform_2, window_bounds = array<i64: 1, 128>}, {pipeline_mode = #tpu.pipeline_mode<synchronous>, transform_indices = @transform_3, window_bounds = array<i64: 128, 128>}, {pipeline_mode = #tpu.pipeline_mode<synchronous>, transform_indices = @transform_4, window_bounds = array<i64: 1, 128>}, {pipeline_mode = #tpu.pipeline_mode<synchronous>, transform_indices = @transform_5, window_bounds = array<i64: 128, 128>}, {pipeline_mode = #tpu.pipeline_mode<synchronous>, transform_indices = @transform_6, window_bounds = array<i64: 1, 128>}, {pipeline_mode = #tpu.pipeline_mode<synchronous>, transform_indices = @transform_7, window_bounds = array<i64: 128, 128>}, {pipeline_mode = #tpu.pipeline_mode<synchronous>, transform_indices = @transform_8, window_bounds = array<i64: 1, 128>}, {transform_indices = @transform_9, window_bounds = array<i64: 8, 128>}]} {
    %c0 = arith.constant 0 : index
    %c0_0 = arith.constant 0 : index
    %0 = vector.load %arg1[%c0, %c0_0] : memref<8x16xf32, #tpu.memory_space<vmem>>, vector<8x16xf32>
    %c0_1 = arith.constant 0 : index
    %c0_2 = arith.constant 0 : index
    %1 = vector.load %arg2[%c0_1, %c0_2] : memref<16x128xf32, #tpu.memory_space<vmem>>, vector<16x128xf32>
    %cst = arith.constant dense<0.000000e+00> : vector<8x128xf32>
    %2 = tpu.matmul %0, %1, %cst {dimension_numbers = #tpu.dot_dimension_numbers<[1], [0], [0], [1], [0, 0, 1, 1], [], []>} : vector<8x16xf32>, vector<16x128xf32>, vector<8x128xf32> -> vector<8x128xf32>
    %c0_3 = arith.constant 0 : index
    %c0_4 = arith.constant 0 : index
    %3 = vector.load %arg3[%c0_3, %c0_4] : memref<1x128xf32, #tpu.memory_space<vmem>>, vector<1x128xf32>
    %4 = vector.broadcast %3 : vector<1x128xf32> to vector<8x128xf32>
    %5 = arith.addf %2, %4 : vector<8x128xf32>
    %6 = math.tanh %5 : vector<8x128xf32>
    %c0_5 = arith.constant 0 : index
    %c0_6 = arith.constant 0 : index
    %7 = vector.load %arg4[%c0_5, %c0_6] : memref<128x128xf32, #tpu.memory_space<vmem>>, vector<128x128xf32>
    %cst_7 = arith.constant dense<0.000000e+00> : vector<8x128xf32>
    %8 = tpu.matmul %6, %7, %cst_7 {dimension_numbers = #tpu.dot_dimension_numbers<[1], [0], [0], [1], [0, 0, 1, 1], [], []>} : vector<8x128xf32>, vector<128x128xf32>, vector<8x128xf32> -> vector<8x128xf32>
    %c0_8 = arith.constant 0 : index
    %c0_9 = arith.constant 0 : index
    %9 = vector.load %arg5[%c0_8, %c0_9] : memref<1x128xf32, #tpu.memory_space<vmem>>, vector<1x128xf32>
    %10 = vector.broadcast %9 : vector<1x128xf32> to vector<8x128xf32>
    %11 = arith.addf %8, %10 : vector<8x128xf32>
    %12 = math.tanh %11 : vector<8x128xf32>
    %c0_10 = arith.constant 0 : index
    %c0_11 = arith.constant 0 : index
    %13 = vector.load %arg6[%c0_10, %c0_11] : memref<128x128xf32, #tpu.memory_space<vmem>>, vector<128x128xf32>
    %cst_12 = arith.constant dense<0.000000e+00> : vector<8x128xf32>
    %14 = tpu.matmul %12, %13, %cst_12 {dimension_numbers = #tpu.dot_dimension_numbers<[1], [0], [0], [1], [0, 0, 1, 1], [], []>} : vector<8x128xf32>, vector<128x128xf32>, vector<8x128xf32> -> vector<8x128xf32>
    %c0_13 = arith.constant 0 : index
    %c0_14 = arith.constant 0 : index
    %15 = vector.load %arg7[%c0_13, %c0_14] : memref<1x128xf32, #tpu.memory_space<vmem>>, vector<1x128xf32>
    %16 = vector.broadcast %15 : vector<1x128xf32> to vector<8x128xf32>
    %17 = arith.addf %14, %16 : vector<8x128xf32>
    %18 = math.tanh %17 : vector<8x128xf32>
    %c0_15 = arith.constant 0 : index
    %c0_16 = arith.constant 0 : index
    %19 = vector.load %arg8[%c0_15, %c0_16] : memref<128x128xf32, #tpu.memory_space<vmem>>, vector<128x128xf32>
    %cst_17 = arith.constant dense<0.000000e+00> : vector<8x128xf32>
    %20 = tpu.matmul %18, %19, %cst_17 {dimension_numbers = #tpu.dot_dimension_numbers<[1], [0], [0], [1], [0, 0, 1, 1], [], []>} : vector<8x128xf32>, vector<128x128xf32>, vector<8x128xf32> -> vector<8x128xf32>
    %c0_18 = arith.constant 0 : index
    %c0_19 = arith.constant 0 : index
    %21 = vector.load %arg9[%c0_18, %c0_19] : memref<1x128xf32, #tpu.memory_space<vmem>>, vector<1x128xf32>
    %22 = vector.broadcast %21 : vector<1x128xf32> to vector<8x128xf32>
    %23 = arith.addf %20, %22 : vector<8x128xf32>
    %c0_20 = arith.constant 0 : index
    %c0_21 = arith.constant 0 : index
    %24 = vector.load %arg10[%c0_20, %c0_21] : memref<8x128xf32, #tpu.memory_space<vmem>>, vector<8x128xf32>
    tpu.vector_store %arg10[%c0_20, %c0_21], %23 {strides = array<i32>} : memref<8x128xf32, #tpu.memory_space<vmem>>, vector<8x128xf32>,
    return
  }
  func.func @transform_0(%arg0: i32) -> (i32, i32) {
    %c0_i32 = arith.constant 0 : i32
    %c0_i32_0 = arith.constant 0 : i32
    return %arg0, %c0_i32 : i32, i32
  }
  func.func @transform_1(%arg0: i32) -> (i32, i32) {
    %c0_i32 = arith.constant 0 : i32
    %c0_i32_0 = arith.constant 0 : i32
    %c0_i32_1 = arith.constant 0 : i32
    return %c0_i32, %c0_i32_0 : i32, i32
  }
  func.func @transform_2(%arg0: i32) -> (i32, i32) {
    %c0_i32 = arith.constant 0 : i32
    %c0_i32_0 = arith.constant 0 : i32
    %c0_i32_1 = arith.constant 0 : i32
    return %c0_i32, %c0_i32_0 : i32, i32
  }
  func.func @transform_3(%arg0: i32) -> (i32, i32) {
    %c0_i32 = arith.constant 0 : i32
    %c0_i32_0 = arith.constant 0 : i32
    %c0_i32_1 = arith.constant 0 : i32
    return %c0_i32, %c0_i32_0 : i32, i32
  }
  func.func @transform_4(%arg0: i32) -> (i32, i32) {
    %c0_i32 = arith.constant 0 : i32
    %c0_i32_0 = arith.constant 0 : i32
    %c0_i32_1 = arith.constant 0 : i32
    return %c0_i32, %c0_i32_0 : i32, i32
  }
  func.func @transform_5(%arg0: i32) -> (i32, i32) {
    %c0_i32 = arith.constant 0 : i32
    %c0_i32_0 = arith.constant 0 : i32
    %c0_i32_1 = arith.constant 0 : i32
    return %c0_i32, %c0_i32_0 : i32, i32
  }
  func.func @transform_6(%arg0: i32) -> (i32, i32) {
    %c0_i32 = arith.constant 0 : i32
    %c0_i32_0 = arith.constant 0 : i32
    %c0_i32_1 = arith.constant 0 : i32
    return %c0_i32, %c0_i32_0 : i32, i32
  }
  func.func @transform_7(%arg0: i32) -> (i32, i32) {
    %c0_i32 = arith.constant 0 : i32
    %c0_i32_0 = arith.constant 0 : i32
    %c0_i32_1 = arith.constant 0 : i32
    return %c0_i32, %c0_i32_0 : i32, i32
  }
  func.func @transform_8(%arg0: i32) -> (i32, i32) {
    %c0_i32 = arith.constant 0 : i32
    %c0_i32_0 = arith.constant 0 : i32
    %c0_i32_1 = arith.constant 0 : i32
    return %c0_i32, %c0_i32_0 : i32, i32
  }
  func.func @transform_9(%arg0: i32) -> (i32, i32) {
    %c0_i32 = arith.constant 0 : i32
    %c0_i32_0 = arith.constant 0 : i32
    return %arg0, %c0_i32 : i32, i32
  }
}

</mosaic_0001>

<bundles_post_ra>
// kernel: feedforward_nn.1
= control target key start
LH: loop header
LB: loop body
LE: loop exit
PB: predicated region body
PF: predicated region fallthrough
CT: control target
= control target key end

     0   :  { %14 = vsyncpa [#allocation3], 0  ;;  %s958_s0 = inlined_call_operand.hbm [shape: f32[8,16], index: 0, kind: input, shape index: {}]   ;;  %s959_s1 = inlined_call_operand.hbm [shape: f32[16,128], index: 1, kind: input, shape index: {}]   ;;  %s960_s2 = inlined_call_operand.vmem [shape: f32[1,128], index: 2, kind: input, shape index: {}]   ;;  %s961_s3 = inlined_call_operand.hbm [shape: f32[128,128], index: 3, kind: input, shape index: {}]   ;;  %s962_s4 = inlined_call_operand.vmem [shape: f32[1,128], index: 4, kind: input, shape index: {}]   ;;  %s963_s5 = inlined_call_operand.hbm [shape: f32[128,128], index: 5, kind: input, shape index: {}]   ;;  %s964_s6 = inlined_call_operand.vmem [shape: f32[1,128], index: 6, kind: input, shape index: {}]   ;;  %s965_s7 = inlined_call_operand.hbm [shape: f32[128,128], index: 7, kind: input, shape index: {}]   ;;  %s966_s8 = inlined_call_operand.vmem [shape: f32[1,128], index: 8, kind: input, shape index: {}]   ;;  %s967_s9 = inlined_call_operand.hbm [shape: f32[8,128], index: 9, kind: output, shape index: {}]  }
   0x1   :  { %15 = vsyncpa [#allocation6], 0 }
   0x2   :  { %16 = vsyncpa [#allocation9], 0 }
   0x3   :  { %17 = vsyncpa [#allocation4], 0  ;;  %s798_s30 = smov [#allocation5]  }
   0x4   :  { %s33_s10 = sshll.u32 %s798_s30, 4  ;;  %s34_s10 = int_to_ptr.vmem [resolvable:$true] %s33_s10 }
   0x5   :  { %s678_s11 = scalar_lea.vmem %s34_s10, 256  ;;  %p683_p1 = scmp.lt.s32.totalorder %s34_s10, %s34_s10 }
   0x6   :  { %p679_p0 = scmp.ne.s32.totalorder %s34_s10, %s678_s11  ;;  %p684_p2 = scmp.lt.s32.totalorder %s678_s11, %s678_s11 }
   0x8   :  { %p685_p3 = por %p684_p2, %p683_p1 }
   0xa   :  { %p686_p4 = pnand %p685_p3, %p679_p0 }
   0xc   :  { %689 = shalt.err (!%p686_p4)
}
   0xd   :  { %s799_s12 = smov 128   ;;  %s800_s13 = smov 8  }
   0xe   :  { %39 = dma.hbm_to_vmem [thread:$0]  %s959_s1, 256, %s34_s10, [#allocation6], %s799_s12, %s799_s12, %s800_s13  }
   0xf   :  { %s801_s16 = smov [#allocation8]   ;;  %s802_s18 = smov [#allocation2]  }
  0x10   :  { %s61_s17 = sshll.u32 %s801_s16, 4  ;;  %s24_s19 = sshll.u32 %s802_s18, 4  ;;  %s62_s17 = int_to_ptr.vmem [resolvable:$true] %s61_s17  ;;  %s25_s19 = int_to_ptr.vmem [resolvable:$true] %s24_s19 }
  0x11   :  { %s698_s20 = scalar_lea.vmem %s62_s17, 2048  ;;  %p703_p6 = scmp.lt.s32.totalorder %s62_s17, %s62_s17 }
  0x12   :  { %p699_p5 = scmp.ne.s32.totalorder %s62_s17, %s698_s20  ;;  %p704_p7 = scmp.lt.s32.totalorder %s698_s20, %s698_s20 }
  0x14   :  { %p705_p8 = por %p704_p7, %p703_p6 }
  0x16   :  { %p706_p9 = pnand %p705_p8, %p699_p5 }
  0x18   :  { %709 = shalt.err (!%p706_p9)
}
  0x19   :  { %67 = dma.hbm_to_vmem [thread:$0]  %s963_s5, 2048, %s62_s17, [#allocation9], %s799_s12, %s799_s12, %s800_s13  }
  0x1a   :  { %s718_s1 = scalar_lea.vmem %s25_s19, 128  ;;  %p723_p11 = scmp.lt.s32.totalorder %s25_s19, %s25_s19 }
  0x1b   :  { %p719_p10 = scmp.ne.s32.totalorder %s25_s19, %s718_s1  ;;  %p724_p12 = scmp.lt.s32.totalorder %s718_s1, %s718_s1 }
  0x1d   :  { %p725_p13 = por %p724_p12, %p723_p11 }
  0x1f   :  { %p726_p0 = pnand %p725_p13, %p719_p10 }
  0x21   :  { %729 = shalt.err (!%p726_p0)
}
  0x22   :  { %27 = dma.hbm_to_vmem [thread:$0]  %s958_s0, 128, %s25_s19, [#allocation3]  }
  0x23   :  { %s803_s25 = smov [#allocation7]   ;;  %s804_s27 = smov [#allocation10]  }
  0x24   :  { %s47_s26 = sshll.u32 %s803_s25, 4  ;;  %s75_s28 = sshll.u32 %s804_s27, 4  ;;  %s48_s26 = int_to_ptr.vmem [resolvable:$true] %s47_s26  ;;  %s76_s28 = int_to_ptr.vmem [resolvable:$true] %s75_s28 }
  0x25   :  { %s738_s29 = scalar_lea.vmem %s48_s26, 2048  ;;  %p743_p2 = scmp.lt.s32.totalorder %s48_s26, %s48_s26 }
  0x26   :  { %p739_p1 = scmp.ne.s32.totalorder %s48_s26, %s738_s29  ;;  %p744_p3 = scmp.lt.s32.totalorder %s738_s29, %s738_s29 }
  0x28   :  { %p745_p4 = por %p744_p3, %p743_p2 }
  0x2a   :  { %p746_p5 = pnand %p745_p4, %p739_p1 }
  0x2c   :  { %749 = shalt.err (!%p746_p5)
}
  0x2d   :  { %53 = dma.hbm_to_vmem [thread:$0]  %s961_s3, 2048, %s48_s26, [#allocation6], %s799_s12, %s799_s12, %s800_s13  }
  0x2e   :  { %s758_s0 = scalar_lea.vmem %s76_s28, 2048  ;;  %p763_p7 = scmp.lt.s32.totalorder %s76_s28, %s76_s28 }
  0x2f   :  { %p759_p6 = scmp.ne.s32.totalorder %s76_s28, %s758_s0  ;;  %p764_p8 = scmp.lt.s32.totalorder %s758_s0, %s758_s0 }
  0x31   :  { %p765_p9 = por %p764_p8, %p763_p7 }
  0x33   :  { %p766_p10 = pnand %p765_p9, %p759_p6 }
  0x35   :  { %769 = shalt.err (!%p766_p10)
}
  0x36   :  { %81 = dma.hbm_to_vmem [thread:$0]  %s965_s7, 2048, %s76_s28, [#allocation9], %s799_s12, %s799_s12, %s800_s13  }
  0x37   :  { %790 = dma.done.wait [#allocation3], 128  }
  0x38   :  { %791 = vsyncadd [#allocation3], 4294967168 }
  0x39   :  { %792 = dma.done.wait [#allocation6], 2304  }
  0x3a   :  { %793 = vsyncadd [#allocation6], 4294964992 }
  0x3b   :  { %794 = dma.done.wait [#allocation9], 4096  }
  0x3c   :  { %795 = vsyncadd [#allocation9], 4294963200  ;;  %v805_v0 = vmov 0.0   ;;  %vm806_vm0 = vmmov 0   ;;  %v101_v1 = vld [vmem:[#allocation5 + $0x8] sm:$0xff]  ;;  %v100_v2 = vld [vmem:[#allocation5] sm:$0xff] }
  0x3d   :  { %542 = vmatprep.subr.mxu0 %v805_v0  ;;  %546 = vmatprep.mubr.msk.f32.mxu0 %vm806_vm0, %v805_v0  ;;  %v99_v3 = vld [vmem:[#allocation2] sm:$0xff]  ;;  %vm109_vm1 = vcmask 130048   ;;  %v199_v4 = vld [vmem:[#allocation7 + $0x78] sm:$0xff]  ;;  %v198_v5 = vld [vmem:[#allocation7 + $0x70] sm:$0xff]  ;;  %s807_s16 = smov [#allocation11]  }
  0x3e   :  { %549 = vmatprep.subr.mxu1 %v805_v0  ;;  %581 = vmatprep.mubr.msk.f32.mxu1 %vm806_vm0, %v805_v0  ;;  %v197_v6 = vld [vmem:[#allocation7 + $0x68] sm:$0xff]  ;;  %v196_v7 = vld [vmem:[#allocation7 + $0x60] sm:$0xff]  ;;  %v195_v8 = vld [vmem:[#allocation7 + $0x58] sm:$0xff]  ;;  %s472_s17 = sshll.u32 %s807_s16, 4  ;;  %s473_s17 = int_to_ptr.vmem [resolvable:$true] %s472_s17 }
  0x3f   :  { %543 = vmatpush3.msra.mxu0 %v101_v1  ;;  %550 = vmatpush3.msra.mxu1 %v199_v4  ;;  %v194_v9 = vld [vmem:[#allocation7 + $0x50] sm:$0xff]  ;;  %v193_v10 = vld [vmem:[#allocation7 + $0x48] sm:$0xff]  ;;  %v192_v11 = vld [vmem:[#allocation7 + $0x40] sm:$0xff]  ;;  %s770_s18 = scalar_lea.vmem %s473_s17, 128  ;;  %p775_p12 = scmp.lt.s32.totalorder %s473_s17, %s473_s17 }
  0x40   :  { %544 = vmatprep.subr.mxu0 %v805_v0  ;;  %551 = vmatprep.subr.mxu1 %v805_v0  ;;  %v191_v12 = vld [vmem:[#allocation7 + $0x38] sm:$0xff]  ;;  %v190_v13 = vld [vmem:[#allocation7 + $0x30] sm:$0xff]  ;;  %v189_v14 = vld [vmem:[#allocation7 + $0x28] sm:$0xff]  ;;  %p771_p11 = scmp.ne.s32.totalorder %s473_s17, %s770_s18  ;;  %p776_p13 = scmp.lt.s32.totalorder %s770_s18, %s770_s18 }
  0x41   :  { %545 = vmatpush3.msra.mxu0 %v100_v2  ;;  %552 = vmatpush3.msra.mxu1 %v198_v5  ;;  %v188_v15 = vld [vmem:[#allocation7 + $0x20] sm:$0xff]  ;;  %v187_v16 = vld [vmem:[#allocation7 + $0x18] sm:$0xff]  ;;  %v186_v17 = vld [vmem:[#allocation7 + $0x10] sm:$0xff] }
  0x42   :  { %547 = vmatmul.mubr.msk.f32.vlgmr.msra.gmra.mxu0 %vm109_vm1, %v99_v3  ;;  %553 = vmatprep.subr.mxu1 %v805_v0  ;;  %v185_v18 = vld [vmem:[#allocation7 + $0x8] sm:$0xff]  ;;  %v184_v19 = vld [vmem:[#allocation7] sm:$0xff]  ;;  %v293_v20 = vld [vmem:[#allocation8 + $0x78] sm:$0xff]  ;;  %p777_p0 = por %p776_p13, %p775_p12 }
  0x43   :  { %584 = vmatprep.subr.mxu0 %v805_v0  ;;  %554 = vmatpush3.msra.mxu1 %v197_v6  ;;  %v292_v21 = vld [vmem:[#allocation8 + $0x70] sm:$0xff]  ;;  %v291_v22 = vld [vmem:[#allocation8 + $0x68] sm:$0xff]  ;;  %v290_v23 = vld [vmem:[#allocation8 + $0x60] sm:$0xff] }
  0x44   :  { %616 = vmatprep.mubr.msk.f32.mxu0 %vm806_vm0, %v805_v0  ;;  %555 = vmatprep.subr.mxu1 %v805_v0  ;;  %v289_v24 = vld [vmem:[#allocation8 + $0x58] sm:$0xff]  ;;  %v288_v25 = vld [vmem:[#allocation8 + $0x50] sm:$0xff]  ;;  %v287_v26 = vld [vmem:[#allocation8 + $0x48] sm:$0xff]  ;;  %p778_p1 = pnand %p777_p0, %p771_p11 }
  0x45   :  { %556 = vmatpush3.msra.mxu1 %v196_v7  ;;  %585 = vmatpush3.msra.mxu0 %v293_v20  ;;  %v483_v27 = vld [vmem:[%s960_s2] ss:$0 sm:$0xff]  ;;  %v286_v32 = vld [vmem:[#allocation8 + $0x40] sm:$0xff]  ;;  %v285_v33 = vld [vmem:[#allocation8 + $0x38] sm:$0xff] }
  0x46   :  { %557 = vmatprep.subr.mxu1 %v805_v0  ;;  %586 = vmatprep.subr.mxu0 %v805_v0  ;;  %v284_v34 = vld [vmem:[#allocation8 + $0x30] sm:$0xff]  ;;  %v283_v35 = vld [vmem:[#allocation8 + $0x28] sm:$0xff]  ;;  %v282_v36 = vld [vmem:[#allocation8 + $0x20] sm:$0xff] }
  0x47   :  { %558 = vmatpush3.msra.mxu1 %v195_v8  ;;  %587 = vmatpush3.msra.mxu0 %v292_v21  ;;  %v281_v37 = vld [vmem:[#allocation8 + $0x18] sm:$0xff]  ;;  %v280_v38 = vld [vmem:[#allocation8 + $0x10] sm:$0xff]  ;;  %v279_v39 = vld [vmem:[#allocation8 + $0x8] sm:$0xff] }
  0x48   :  { %559 = vmatprep.subr.mxu1 %v805_v0  ;;  %588 = vmatprep.subr.mxu0 %v805_v0  ;;  %v278_v40 = vld [vmem:[#allocation8] sm:$0xff]  ;;  %v387_v41 = vld [vmem:[#allocation10 + $0x78] sm:$0xff]  ;;  %v386_v42 = vld [vmem:[#allocation10 + $0x70] sm:$0xff] }
  0x49   :  { %560 = vmatpush3.msra.mxu1 %v194_v9  ;;  %589 = vmatpush3.msra.mxu0 %v291_v22  ;;  %v385_v43 = vld [vmem:[#allocation10 + $0x68] sm:$0xff]  ;;  %v384_v44 = vld [vmem:[#allocation10 + $0x60] sm:$0xff]  ;;  %v383_v45 = vld [vmem:[#allocation10 + $0x58] sm:$0xff] }
  0x4a   :  { %561 = vmatprep.subr.mxu1 %v805_v0  ;;  %590 = vmatprep.subr.mxu0 %v805_v0  ;;  %v382_v46 = vld [vmem:[#allocation10 + $0x50] sm:$0xff]  ;;  %v381_v47 = vld [vmem:[#allocation10 + $0x48] sm:$0xff]  ;;  %v380_v53 = vld [vmem:[#allocation10 + $0x40] sm:$0xff] }
  0x4b   :  { %562 = vmatpush3.msra.mxu1 %v193_v10  ;;  %591 = vmatpush3.msra.mxu0 %v290_v23  ;;  %v485_v48 = vld [vmem:[%s962_s4] ss:$0 sm:$0xff]  ;;  %v379_v54 = vld [vmem:[#allocation10 + $0x38] sm:$0xff]  ;;  %v378_v55 = vld [vmem:[#allocation10 + $0x30] sm:$0xff] }
  0x4c   :  { %563 = vmatprep.subr.mxu1 %v805_v0  ;;  %592 = vmatprep.subr.mxu0 %v805_v0  ;;  %v377_v56 = vld [vmem:[#allocation10 + $0x28] sm:$0xff]  ;;  %v376_v57 = vld [vmem:[#allocation10 + $0x20] sm:$0xff]  ;;  %v375_v58 = vld [vmem:[#allocation10 + $0x18] sm:$0xff] }
  0x4d   :  { %564 = vmatpush3.msra.mxu1 %v192_v11  ;;  %593 = vmatpush3.msra.mxu0 %v289_v24  ;;  %v374_v59 = vld [vmem:[#allocation10 + $0x10] sm:$0xff]  ;;  %v373_v60 = vld [vmem:[#allocation10 + $0x8] sm:$0xff]  ;;  %v372_v61 = vld [vmem:[#allocation10] sm:$0xff] }
  0x4e   :  { %565 = vmatprep.subr.mxu1 %v805_v0  ;;  %594 = vmatprep.subr.mxu0 %v805_v0  ;;  %v486_v62 = vld [vmem:[%s964_s6] ss:$0 sm:$0xff] }
  0x4f   :  { %566 = vmatpush3.msra.mxu1 %v191_v12  ;;  %595 = vmatpush3.msra.mxu0 %v288_v25  ;;  %v487_v4 = vld [vmem:[%s966_s8] ss:$0 sm:$0xff] }
  0x50   :  { %567 = vmatprep.subr.mxu1 %v805_v0  ;;  %596 = vmatprep.subr.mxu0 %v805_v0 }
  0x51   :  { %568 = vmatpush3.msra.mxu1 %v190_v13  ;;  %597 = vmatpush3.msra.mxu0 %v287_v26 }
  0x52   :  { %569 = vmatprep.subr.mxu1 %v805_v0  ;;  %598 = vmatprep.subr.mxu0 %v805_v0 }
  0x53   :  { %570 = vmatpush3.msra.mxu1 %v189_v14  ;;  %599 = vmatpush3.msra.mxu0 %v286_v32 }
  0x54   :  { %571 = vmatprep.subr.mxu1 %v805_v0  ;;  %600 = vmatprep.subr.mxu0 %v805_v0 }
  0x55   :  { %572 = vmatpush3.msra.mxu1 %v188_v15  ;;  %601 = vmatpush3.msra.mxu0 %v285_v33 }
  0x56   :  { %573 = vmatprep.subr.mxu1 %v805_v0  ;;  %602 = vmatprep.subr.mxu0 %v805_v0 }
  0x57   :  { %574 = vmatpush3.msra.mxu1 %v187_v16  ;;  %603 = vmatpush3.msra.mxu0 %v284_v34 }
  0x58   :  { %575 = vmatprep.subr.mxu1 %v805_v0  ;;  %604 = vmatprep.subr.mxu0 %v805_v0 }
  0x59   :  { %576 = vmatpush3.msra.mxu1 %v186_v17  ;;  %605 = vmatpush3.msra.mxu0 %v283_v35 }
  0x5a   :  { %577 = vmatprep.subr.mxu1 %v805_v0  ;;  %606 = vmatprep.subr.mxu0 %v805_v0 }
  0x5b   :  { %578 = vmatpush3.msra.mxu1 %v185_v18  ;;  %607 = vmatpush3.msra.mxu0 %v282_v36 }
  0x5c   :  { %579 = vmatprep.subr.mxu1 %v805_v0  ;;  %608 = vmatprep.subr.mxu0 %v805_v0 }
  0x5d   :  { %580 = vmatpush3.msra.mxu1 %v184_v19  ;;  %609 = vmatpush3.msra.mxu0 %v281_v37 }
  0x5e   :  { %619 = vmatprep.subr.mxu1 %v805_v0  ;;  %610 = vmatprep.subr.mxu0 %v805_v0 }
  0x5f   :  { %611 = vmatpush3.msra.mxu0 %v280_v38 }
  0x60   :  { %612 = vmatprep.subr.mxu0 %v805_v0 }
  0x61   :  { %613 = vmatpush3.msra.mxu0 %v279_v39 }
  0x62   :  { %614 = vmatprep.subr.mxu0 %v805_v0 }
  0x63   :  { %615 = vmatpush3.msra.mxu0 %v278_v40 }
 0x102   :  { %v179_v28 = vpop.f32.mrf.mxu0 }
 0x103   :  { %v180_v29 = vadd.f32 %v483_v27, %v179_v28 }
 0x104   :  { %v548_v30 = vpop.f32.mrf.mxu0 }
 0x105   :  { %664 = vtanh.f32 %v180_v29 }
 0x112   :  { %v665_v31 = vpop.eup %664 }
 0x113   :  { %582 = vmatmul.mubr.f32.vlgmr.msra.gmra.mxu1 %v665_v31 }
 0x114   :  { %651 = vmatprep.mubr.msk.f32.mxu1 %vm806_vm0, %v805_v0  ;;  %620 = vmatpush3.msra.mxu1 %v387_v41 }
 0x115   :  { %621 = vmatprep.subr.mxu1 %v805_v0 }
 0x116   :  { %622 = vmatpush3.msra.mxu1 %v386_v42 }
 0x117   :  { %623 = vmatprep.subr.mxu1 %v805_v0 }
 0x118   :  { %624 = vmatpush3.msra.mxu1 %v385_v43 }
 0x119   :  { %625 = vmatprep.subr.mxu1 %v805_v0 }
 0x11a   :  { %626 = vmatpush3.msra.mxu1 %v384_v44 }
 0x11b   :  { %627 = vmatprep.subr.mxu1 %v805_v0 }
 0x11c   :  { %628 = vmatpush3.msra.mxu1 %v383_v45 }
 0x11d   :  { %629 = vmatprep.subr.mxu1 %v805_v0 }
 0x11e   :  { %630 = vmatpush3.msra.mxu1 %v382_v46 }
 0x11f   :  { %631 = vmatprep.subr.mxu1 %v805_v0 }
 0x120   :  { %632 = vmatpush3.msra.mxu1 %v381_v47 }
 0x121   :  { %633 = vmatprep.subr.mxu1 %v805_v0 }
 0x122   :  { %634 = vmatpush3.msra.mxu1 %v380_v53 }
 0x123   :  { %635 = vmatprep.subr.mxu1 %v805_v0 }
 0x124   :  { %636 = vmatpush3.msra.mxu1 %v379_v54 }
 0x125   :  { %637 = vmatprep.subr.mxu1 %v805_v0 }
 0x126   :  { %638 = vmatpush3.msra.mxu1 %v378_v55 }
 0x127   :  { %639 = vmatprep.subr.mxu1 %v805_v0 }
 0x128   :  { %640 = vmatpush3.msra.mxu1 %v377_v56 }
 0x129   :  { %641 = vmatprep.subr.mxu1 %v805_v0 }
 0x12a   :  { %642 = vmatpush3.msra.mxu1 %v376_v57 }
 0x12b   :  { %643 = vmatprep.subr.mxu1 %v805_v0 }
 0x12c   :  { %644 = vmatpush3.msra.mxu1 %v375_v58 }
 0x12d   :  { %645 = vmatprep.subr.mxu1 %v805_v0 }
 0x12e   :  { %646 = vmatpush3.msra.mxu1 %v374_v59 }
 0x12f   :  { %647 = vmatprep.subr.mxu1 %v805_v0 }
 0x130   :  { %648 = vmatpush3.msra.mxu1 %v373_v60 }
 0x131   :  { %649 = vmatprep.subr.mxu1 %v805_v0 }
 0x132   :  { %650 = vmatpush3.msra.mxu1 %v372_v61 }
 0x1d3   :  { %v273_v49 = vpop.f32.mrf.mxu1 }
 0x1d4   :  { %v274_v50 = vadd.f32 %v485_v48, %v273_v49 }
 0x1d5   :  { %v583_v51 = vpop.f32.mrf.mxu1 }
 0x1d6   :  { %666 = vtanh.f32 %v274_v50 }
 0x1e3   :  { %v667_v52 = vpop.eup %666 }
 0x1e4   :  { %617 = vmatmul.mubr.f32.vlgmr.msra.gmra.mxu0 %v667_v52 }
 0x2a4   :  { %v367_v63 = vpop.f32.mrf.mxu0 }
 0x2a5   :  { %v368_v1 = vadd.f32 %v486_v62, %v367_v63 }
 0x2a6   :  { %v618_v2 = vpop.f32.mrf.mxu0 }
 0x2a7   :  { %668 = vtanh.f32 %v368_v1 }
 0x2b4   :  { %v669_v3 = vpop.eup %668 }
 0x2b5   :  { %652 = vmatmul.mubr.f32.vlgmr.msra.gmra.mxu1 %v669_v3 }
 0x375   :  { %v461_v5 = vpop.f32.mrf.mxu1 }
 0x376   :  { %v462_v6 = vadd.f32 %v487_v4, %v461_v5 }
 0x377   :  { %v653_v0 = vpop.f32.mrf.mxu1 }
 0x378   :  { %465 = vst [vmem:[#allocation11] sm:$0xff] %v462_v6 }
 0x379   :  { %781 = shalt.err (!%p778_p1)
}
 0x37a   :  { %475 = dma.vmem_to_hbm [thread:$0]  %s473_s17, 128, %s967_s9, [#allocation4]  }
 0x37b   :  { %796 = dma.done.wait [#allocation4], 128  }
 0x37c   :  { %797 = vsyncadd [#allocation4], 4294967168 }
 0x37d   :  { %479 = vsyncpa [#allocation3], 1 }
 0x37e   :  { %480 = vsyncpa [#allocation6], 1 }
 0x37f   :  { %481 = vsyncpa [#allocation9], 1 }
 0x380   :  { %482 = vsyncpa [#allocation4], 1 }

</bundles_post_ra>
